<compile_context>
chip_gen: v7x
topology: tpu7x:2x2x1
jax: 0.10.0
libtpu: 0.0.40
codegen_flags: <defaults>
</compile_context>

<pallas_src>
from functools import partial

import jax
import jax.numpy as jnp
from jax.experimental import pallas as pl
from jax.experimental.pallas import tpu as pltpu

EPS = 1e-5
PAD = 128          # all feature dims padded to one lane-width
MAX_BATCH = 8192   # resident-batch cap (keeps ~[B,128] f32 buffers well inside
                   # scoped VMEM on every generation, incl. v7x's 64 MiB)

# Row layout of the packed vector slab [8, PAD]:
#   0: b1   1: g1   2: be1   3: b2   4: g2   5: be2   6: b3   7: b4


def dqn_kernel(x_ref, w_ref, v_ref, out_ref, *, matmul_dtype):
    x = x_ref[...]  # [B, PAD] f32, columns >= state_size are exactly 0

    def linear(h, wi, bi):
        w = w_ref[wi]                              # [PAD, PAD]
        b = v_ref[bi:bi + 1, :]                    # [1, PAD]
        return jnp.dot(h.astype(matmul_dtype), w.astype(matmul_dtype),
                       preferred_element_type=jnp.float32) + b

    def batchnorm(h, gi, bei):
        # Training-mode BatchNorm1d, single statistics pass:
        # bind hm = h - mu once and reuse for variance and normalization.
        inv_b = 1.0 / h.shape[0]
        mu = jnp.sum(h, axis=0, keepdims=True) * inv_b
        hm = h - mu
        var = jnp.sum(hm * hm, axis=0, keepdims=True) * inv_b
        h_hat = hm * jax.lax.rsqrt(var + EPS)
        return h_hat * v_ref[gi:gi + 1, :] + v_ref[bei:bei + 1, :]

    # fc1 -> relu -> bn1
    h = linear(x, 0, 0)
    h = jnp.maximum(h, 0.0)
    h = batchnorm(h, 1, 2)

    # fc2 -> relu -> bn2
    h = linear(h, 1, 3)
    h = jnp.maximum(h, 0.0)
    h = batchnorm(h, 4, 5)

    # fc3 -> relu   (bn3 is unused in the PyTorch forward)
    h = linear(h, 2, 6)
    h = jnp.maximum(h, 0.0)

    # fc4 (no activation); output is lane-dense [B, PAD], wrapper slices to 4.
    out_ref[...] = linear(h, 3, 7).astype(out_ref.dtype)


def dqn_forward(state, wslab, vslab, action_size, *, matmul_dtype=jnp.float32):
    """state: [B, state_size] f32.  wslab: [4, PAD, PAD].  vslab: [8, PAD]."""
    B, state_size = state.shape
    assert B <= MAX_BATCH, "split replay batch into <= MAX_BATCH chunks per call"
    # TODO(synk): batches larger than one resident block need a batch grid axis
    # with two-pass BN (whole-batch statistics), not naive per-tile BN.

    # Layout plumbing only: pad input features to a full lane width with zeros.
    x_pad = jnp.zeros((B, PAD), jnp.float32).at[:, :state_size].set(state)

    out_pad = pl.pallas_call(
        partial(dqn_kernel, matmul_dtype=matmul_dtype),
        out_shape=jax.ShapeDtypeStruct((B, PAD), jnp.float32),
        in_specs=[pl.BlockSpec(memory_space=pltpu.MemorySpace.VMEM)] * 3,
        out_specs=pl.BlockSpec(memory_space=pltpu.MemorySpace.VMEM),
        compiler_params=pltpu.CompilerParams(vmem_limit_bytes=48 * 1024 * 1024),
    )(x_pad, wslab, vslab)
    return out_pad[:, :action_size]


def init_params(key, state_size, action_size, fc1_size, fc2_size, fc3_size):
    """Deterministic synthetic parameter init (not a checkpoint load)."""
    ks = jax.random.split(key, 12)

    def lin(kw, kb, fan_in, fan_out):
        bound = 1.0 / jnp.sqrt(jnp.float32(fan_in))
        # Stored as [in, out] (transposed relative to PyTorch's [out, in]).
        w = jax.random.uniform(kw, (fan_in, fan_out), jnp.float32, -bound, bound)
        b = jax.random.uniform(kb, (fan_out,), jnp.float32, -bound, bound)
        return w, b

    w1, b1 = lin(ks[0], ks[1], state_size, fc1_size)
    w2, b2 = lin(ks[2], ks[3], fc1_size, fc2_size)
    w3, b3 = lin(ks[4], ks[5], fc2_size, fc3_size)
    w4, b4 = lin(ks[6], ks[7], fc3_size, action_size)

    # BatchNorm affine params (non-trivial so the BN path is exercised).
    g1 = 1.0 + 0.1 * jax.random.normal(ks[8], (fc1_size,), jnp.float32)
    be1 = 0.1 * jax.random.normal(ks[9], (fc1_size,), jnp.float32)
    g2 = 1.0 + 0.1 * jax.random.normal(ks[10], (fc2_size,), jnp.float32)
    be2 = 0.1 * jax.random.normal(ks[11], (fc2_size,), jnp.float32)

    return dict(w1=w1, b1=b1, g1=g1, be1=be1,
                w2=w2, b2=b2, g2=g2, be2=be2,
                w3=w3, b3=b3, w4=w4, b4=b4)


def pack_params(p):
    """Pack the 13 parameter tensors into one weight slab + one vector slab.

    Padding values are 0 everywhere, which keeps the padded feature columns
    exactly 0 through linear / ReLU / BN.
    """
    wslab = jnp.zeros((4, PAD, PAD), jnp.float32)
    for i, w in enumerate((p["w1"], p["w2"], p["w3"], p["w4"])):
        fi, fo = w.shape
        wslab = wslab.at[i, :fi, :fo].set(w)

    vslab = jnp.zeros((8, PAD), jnp.float32)
    for i, v in enumerate((p["b1"], p["g1"], p["be1"],
                           p["b2"], p["g2"], p["be2"],
                           p["b3"], p["b4"])):
        vslab = vslab.at[i, :v.shape[0]].set(v)
    return wslab, vslab


def reference_forward(state, p):
    """Pure-JAX reference (unpacked params) for sanity checking."""
    def bn(h, g, be):
        mu = jnp.mean(h, axis=0, keepdims=True)
        var = jnp.mean((h - mu) ** 2, axis=0, keepdims=True)
        return (h - mu) / jnp.sqrt(var + EPS) * g[None, :] + be[None, :]

    h = jnp.maximum(state @ p["w1"] + p["b1"][None, :], 0.0)
    h = bn(h, p["g1"], p["be1"])
    h = jnp.maximum(h @ p["w2"] + p["b2"][None, :], 0.0)
    h = bn(h, p["g2"], p["be2"])
    h = jnp.maximum(h @ p["w3"] + p["b3"][None, :], 0.0)
    return h @ p["w4"] + p["b4"][None, :]


if __name__ == "__main__":
    # 2048 board flattened: 16 cells; 4 actions (up/down/left/right).
    state_size, action_size = 16, 4
    fc1_size, fc2_size, fc3_size = 64, 64, 32
    batch = 8  # BatchNorm1d training mode needs batch > 1

    key = jax.random.PRNGKey(0)
    k_param, k_x = jax.random.split(key)
    params = init_params(k_param, state_size, action_size,
                         fc1_size, fc2_size, fc3_size)
    wslab, vslab = pack_params(params)
    state = jax.random.normal(k_x, (batch, state_size), jnp.float32)

    out = dqn_forward(state, wslab, vslab, action_size)
    out = jax.block_until_ready(out)

    ref = reference_forward(state, params)
    assert out.shape == (batch, action_size)
    assert jnp.allclose(out, ref, atol=1e-4, rtol=1e-4), "mismatch vs reference"

    print("KERNEL_OK")
</pallas_src>

<mosaic_0001>
module attributes {stable_mosaic.version = 11 : i64} {
  func.func @dqn_kernel(%arg0: memref<8x128xf32, #tpu.memory_space<vmem>>, %arg1: memref<4x128x128xf32, #tpu.memory_space<vmem>>, %arg2: memref<8x128xf32, #tpu.memory_space<vmem>>, %arg3: memref<8x128xf32, #tpu.memory_space<vmem>>) attributes {dimension_semantics = [], scalar_prefetch = 0 : i64, scratch_operands = 0 : i64, tpu.core_type = #tpu.core_type<tc>} {
    %c0 = arith.constant 0 : index
    %c0_0 = arith.constant 0 : index
    %0 = vector.load %arg0[%c0, %c0_0] : memref<8x128xf32, #tpu.memory_space<vmem>>, vector<8x128xf32>
    %c0_1 = arith.constant 0 : index
    %c0_2 = arith.constant 0 : index
    %c0_3 = arith.constant 0 : index
    %1 = vector.load %arg1[%c0_1, %c0_2, %c0_3] : memref<4x128x128xf32, #tpu.memory_space<vmem>>, vector<1x128x128xf32>
    %2 = vector.shape_cast %1 : vector<1x128x128xf32> to vector<128x128xf32>
    %c0_4 = arith.constant 0 : index
    %c0_5 = arith.constant 0 : index
    %3 = vector.load %arg2[%c0_4, %c0_5] : memref<8x128xf32, #tpu.memory_space<vmem>>, vector<1x128xf32>
    %cst = arith.constant dense<0.000000e+00> : vector<8x128xf32>
    %4 = tpu.matmul %0, %2, %cst {dimension_numbers = #tpu.dot_dimension_numbers<[1], [0], [0], [1], [0, 0, 1, 1], [], []>} : vector<8x128xf32>, vector<128x128xf32>, vector<8x128xf32> -> vector<8x128xf32>
    %5 = vector.broadcast %3 : vector<1x128xf32> to vector<8x128xf32>
    %6 = arith.addf %4, %5 : vector<8x128xf32>
    %cst_6 = arith.constant 0.000000e+00 : f32
    %7 = vector.broadcast %cst_6 : f32 to vector<8x128xf32>
    %8 = arith.maximumf %6, %7 : vector<8x128xf32>
    %cst_7 = arith.constant dense<0.000000e+00> : vector<128xf32>
    %9 = vector.multi_reduction <add>, %8, %cst_7 [0] : vector<8x128xf32> to vector<128xf32>
    %10 = vector.shape_cast %9 : vector<128xf32> to vector<1x128xf32>
    %cst_8 = arith.constant 1.250000e-01 : f32
    %11 = vector.broadcast %cst_8 : f32 to vector<1x128xf32>
    %12 = arith.mulf %10, %11 : vector<1x128xf32>
    %13 = vector.broadcast %12 : vector<1x128xf32> to vector<8x128xf32>
    %14 = arith.subf %8, %13 : vector<8x128xf32>
    %15 = arith.mulf %14, %14 : vector<8x128xf32>
    %cst_9 = arith.constant dense<0.000000e+00> : vector<128xf32>
    %16 = vector.multi_reduction <add>, %15, %cst_9 [0] : vector<8x128xf32> to vector<128xf32>
    %17 = vector.shape_cast %16 : vector<128xf32> to vector<1x128xf32>
    %cst_10 = arith.constant 1.250000e-01 : f32
    %18 = vector.broadcast %cst_10 : f32 to vector<1x128xf32>
    %19 = arith.mulf %17, %18 : vector<1x128xf32>
    %cst_11 = arith.constant 9.99999974E-6 : f32
    %20 = vector.broadcast %cst_11 : f32 to vector<1x128xf32>
    %21 = arith.addf %19, %20 : vector<1x128xf32>
    %22 = math.rsqrt %21 : vector<1x128xf32>
    %23 = vector.broadcast %22 : vector<1x128xf32> to vector<8x128xf32>
    %24 = arith.mulf %14, %23 : vector<8x128xf32>
    %c1 = arith.constant 1 : index
    %c0_12 = arith.constant 0 : index
    %25 = vector.load %arg2[%c1, %c0_12] : memref<8x128xf32, #tpu.memory_space<vmem>>, vector<1x128xf32>
    %26 = vector.broadcast %25 : vector<1x128xf32> to vector<8x128xf32>
    %27 = arith.mulf %24, %26 : vector<8x128xf32>
    %c2 = arith.constant 2 : index
    %c0_13 = arith.constant 0 : index
    %28 = vector.load %arg2[%c2, %c0_13] : memref<8x128xf32, #tpu.memory_space<vmem>>, vector<1x128xf32>
    %29 = vector.broadcast %28 : vector<1x128xf32> to vector<8x128xf32>
    %30 = arith.addf %27, %29 : vector<8x128xf32>
    %c1_14 = arith.constant 1 : index
    %c0_15 = arith.constant 0 : index
    %c0_16 = arith.constant 0 : index
    %31 = vector.load %arg1[%c1_14, %c0_15, %c0_16] : memref<4x128x128xf32, #tpu.memory_space<vmem>>, vector<1x128x128xf32>
    %32 = vector.shape_cast %31 : vector<1x128x128xf32> to vector<128x128xf32>
    %c3 = arith.constant 3 : index
    %c0_17 = arith.constant 0 : index
    %33 = vector.load %arg2[%c3, %c0_17] : memref<8x128xf32, #tpu.memory_space<vmem>>, vector<1x128xf32>
    %cst_18 = arith.constant dense<0.000000e+00> : vector<8x128xf32>
    %34 = tpu.matmul %30, %32, %cst_18 {dimension_numbers = #tpu.dot_dimension_numbers<[1], [0], [0], [1], [0, 0, 1, 1], [], []>} : vector<8x128xf32>, vector<128x128xf32>, vector<8x128xf32> -> vector<8x128xf32>
    %35 = vector.broadcast %33 : vector<1x128xf32> to vector<8x128xf32>
    %36 = arith.addf %34, %35 : vector<8x128xf32>
    %cst_19 = arith.constant 0.000000e+00 : f32
    %37 = vector.broadcast %cst_19 : f32 to vector<8x128xf32>
    %38 = arith.maximumf %36, %37 : vector<8x128xf32>
    %cst_20 = arith.constant dense<0.000000e+00> : vector<128xf32>
    %39 = vector.multi_reduction <add>, %38, %cst_20 [0] : vector<8x128xf32> to vector<128xf32>
    %40 = vector.shape_cast %39 : vector<128xf32> to vector<1x128xf32>
    %cst_21 = arith.constant 1.250000e-01 : f32
    %41 = vector.broadcast %cst_21 : f32 to vector<1x128xf32>
    %42 = arith.mulf %40, %41 : vector<1x128xf32>
    %43 = vector.broadcast %42 : vector<1x128xf32> to vector<8x128xf32>
    %44 = arith.subf %38, %43 : vector<8x128xf32>
    %45 = arith.mulf %44, %44 : vector<8x128xf32>
    %cst_22 = arith.constant dense<0.000000e+00> : vector<128xf32>
    %46 = vector.multi_reduction <add>, %45, %cst_22 [0] : vector<8x128xf32> to vector<128xf32>
    %47 = vector.shape_cast %46 : vector<128xf32> to vector<1x128xf32>
    %cst_23 = arith.constant 1.250000e-01 : f32
    %48 = vector.broadcast %cst_23 : f32 to vector<1x128xf32>
    %49 = arith.mulf %47, %48 : vector<1x128xf32>
    %cst_24 = arith.constant 9.99999974E-6 : f32
    %50 = vector.broadcast %cst_24 : f32 to vector<1x128xf32>
    %51 = arith.addf %49, %50 : vector<1x128xf32>
    %52 = math.rsqrt %51 : vector<1x128xf32>
    %53 = vector.broadcast %52 : vector<1x128xf32> to vector<8x128xf32>
    %54 = arith.mulf %44, %53 : vector<8x128xf32>
    %c4 = arith.constant 4 : index
    %c0_25 = arith.constant 0 : index
    %55 = vector.load %arg2[%c4, %c0_25] : memref<8x128xf32, #tpu.memory_space<vmem>>, vector<1x128xf32>
    %56 = vector.broadcast %55 : vector<1x128xf32> to vector<8x128xf32>
    %57 = arith.mulf %54, %56 : vector<8x128xf32>
    %c5 = arith.constant 5 : index
    %c0_26 = arith.constant 0 : index
    %58 = vector.load %arg2[%c5, %c0_26] : memref<8x128xf32, #tpu.memory_space<vmem>>, vector<1x128xf32>
    %59 = vector.broadcast %58 : vector<1x128xf32> to vector<8x128xf32>
    %60 = arith.addf %57, %59 : vector<8x128xf32>
    %c2_27 = arith.constant 2 : index
    %c0_28 = arith.constant 0 : index
    %c0_29 = arith.constant 0 : index
    %61 = vector.load %arg1[%c2_27, %c0_28, %c0_29] : memref<4x128x128xf32, #tpu.memory_space<vmem>>, vector<1x128x128xf32>
    %62 = vector.shape_cast %61 : vector<1x128x128xf32> to vector<128x128xf32>
    %c6 = arith.constant 6 : index
    %c0_30 = arith.constant 0 : index
    %63 = vector.load %arg2[%c6, %c0_30] : memref<8x128xf32, #tpu.memory_space<vmem>>, vector<1x128xf32>
    %cst_31 = arith.constant dense<0.000000e+00> : vector<8x128xf32>
    %64 = tpu.matmul %60, %62, %cst_31 {dimension_numbers = #tpu.dot_dimension_numbers<[1], [0], [0], [1], [0, 0, 1, 1], [], []>} : vector<8x128xf32>, vector<128x128xf32>, vector<8x128xf32> -> vector<8x128xf32>
    %65 = vector.broadcast %63 : vector<1x128xf32> to vector<8x128xf32>
    %66 = arith.addf %64, %65 : vector<8x128xf32>
    %cst_32 = arith.constant 0.000000e+00 : f32
    %67 = vector.broadcast %cst_32 : f32 to vector<8x128xf32>
    %68 = arith.maximumf %66, %67 : vector<8x128xf32>
    %c3_33 = arith.constant 3 : index
    %c0_34 = arith.constant 0 : index
    %c0_35 = arith.constant 0 : index
    %69 = vector.load %arg1[%c3_33, %c0_34, %c0_35] : memref<4x128x128xf32, #tpu.memory_space<vmem>>, vector<1x128x128xf32>
    %70 = vector.shape_cast %69 : vector<1x128x128xf32> to vector<128x128xf32>
    %c7 = arith.constant 7 : index
    %c0_36 = arith.constant 0 : index
    %71 = vector.load %arg2[%c7, %c0_36] : memref<8x128xf32, #tpu.memory_space<vmem>>, vector<1x128xf32>
    %cst_37 = arith.constant dense<0.000000e+00> : vector<8x128xf32>
    %72 = tpu.matmul %68, %70, %cst_37 {dimension_numbers = #tpu.dot_dimension_numbers<[1], [0], [0], [1], [0, 0, 1, 1], [], []>} : vector<8x128xf32>, vector<128x128xf32>, vector<8x128xf32> -> vector<8x128xf32>
    %73 = vector.broadcast %71 : vector<1x128xf32> to vector<8x128xf32>
    %74 = arith.addf %72, %73 : vector<8x128xf32>
    %c0_38 = arith.constant 0 : index
    %c0_39 = arith.constant 0 : index
    %75 = vector.load %arg3[%c0_38, %c0_39] : memref<8x128xf32, #tpu.memory_space<vmem>>, vector<8x128xf32>
    tpu.vector_store %arg3[%c0_38, %c0_39], %74 {strides = array<i32>} : memref<8x128xf32, #tpu.memory_space<vmem>>, vector<8x128xf32>,
    return
  }
}

</mosaic_0001>

<bundles_post_ra>
// kernel: tpu_custom_call.1
= control target key start
LH: loop header
LB: loop body
LE: loop exit
PB: predicated region body
PF: predicated region fallthrough
CT: control target
= control target key end

     0   :  { %8 = vsyncpa [#allocation3], 0  ;;  %s1038_s0 = inlined_call_operand.hbm [shape: f32[8,128], index: 0, kind: input, shape index: {}]   ;;  %s1039_s1 = inlined_call_operand.hbm [shape: f32[4,128,128], index: 1, kind: input, shape index: {}]   ;;  %s1040_s2 = inlined_call_operand.hbm [shape: f32[8,128], index: 2, kind: input, shape index: {}]   ;;  %s1041_s3 = inlined_call_operand.hbm [shape: f32[8,128], index: 3, kind: output, shape index: {}]  }
   0x1   :  { %9 = vsyncpa [#allocation6], 0 }
   0x2   :  { %10 = vsyncpa [#allocation4], 0  ;;  %s921_s12 = smov [#allocation5]   ;;  %s827_s16 = scalar_lea.hbm %s1039_s1, 8192 }
   0x3   :  { %s26_s13 = sshll.u32 %s921_s12, 4  ;;  %p828_p0 = scmp.ne.s32.totalorder %s1039_s1, %s827_s16  ;;  %s27_s13 = int_to_ptr.vmem [resolvable:$true] %s26_s13 }
   0x4   :  { %p831_p1 = scmp.lt.u32.totalorder %s827_s16, %s1039_s1 }
   0x6   :  { %p833_p2 = pnand %p831_p1, %p828_p0 }
   0x8   :  { %836 = shalt.err (!%p833_p2)
}
   0x9   :  { %s837_s21 = scalar_lea.vmem %s27_s13, 8192  ;;  %p842_p4 = scmp.lt.s32.totalorder %s27_s13, %s27_s13 }
   0xa   :  { %p838_p3 = scmp.ne.s32.totalorder %s27_s13, %s837_s21  ;;  %p843_p5 = scmp.lt.s32.totalorder %s837_s21, %s837_s21 }
   0xc   :  { %p844_p6 = por %p843_p5, %p842_p4 }
   0xe   :  { %p845_p7 = pnand %p844_p6, %p838_p3 }
  0x10   :  { %848 = shalt.err (!%p845_p7)
}
  0x11   :  { %s922_s22 = smov 128   ;;  %s923_s23 = smov 8  }
  0x12   :  { %32 = dma.hbm_to_vmem [thread:$0]  %s1039_s1, 8192, %s27_s13, [#allocation6], %s922_s22, %s922_s22, %s923_s23  }
  0x13   :  { %s924_s26 = smov [#allocation2]   ;;  %s925_s28 = smov [#allocation7]  }
  0x14   :  { %s17_s27 = sshll.u32 %s924_s26, 4  ;;  %s39_s29 = sshll.u32 %s925_s28, 4  ;;  %s18_s27 = int_to_ptr.vmem [resolvable:$true] %s17_s27  ;;  %s40_s29 = int_to_ptr.vmem [resolvable:$true] %s39_s29 }
  0x15   :  { %s849_s5 = scalar_lea.hbm %s1038_s0, 128 }
  0x16   :  { %p850_p8 = scmp.ne.s32.totalorder %s1038_s0, %s849_s5  ;;  %p853_p9 = scmp.lt.u32.totalorder %s849_s5, %s1038_s0 }
  0x18   :  { %p855_p10 = pnand %p853_p9, %p850_p8 }
  0x1a   :  { %858 = shalt.err (!%p855_p10)
}
  0x1b   :  { %s859_s1 = scalar_lea.vmem %s18_s27, 128  ;;  %p864_p12 = scmp.lt.s32.totalorder %s18_s27, %s18_s27 }
  0x1c   :  { %p860_p11 = scmp.ne.s32.totalorder %s18_s27, %s859_s1  ;;  %p865_p13 = scmp.lt.s32.totalorder %s859_s1, %s859_s1 }
  0x1e   :  { %p866_p0 = por %p865_p13, %p864_p12 }
  0x20   :  { %p867_p1 = pnand %p866_p0, %p860_p11 }
  0x22   :  { %870 = shalt.err (!%p867_p1)
}
  0x23   :  { %20 = dma.hbm_to_vmem [thread:$0]  %s1038_s0, 128, %s18_s27, [#allocation3]  }
  0x24   :  { %s871_s14 = scalar_lea.hbm %s1040_s2, 128 }
  0x25   :  { %p872_p2 = scmp.ne.s32.totalorder %s1040_s2, %s871_s14  ;;  %p875_p3 = scmp.lt.u32.totalorder %s871_s14, %s1040_s2 }
  0x27   :  { %p877_p4 = pnand %p875_p3, %p872_p2 }
  0x29   :  { %880 = shalt.err (!%p877_p4)
}
  0x2a   :  { %s881_s19 = scalar_lea.vmem %s40_s29, 128  ;;  %p886_p6 = scmp.lt.s32.totalorder %s40_s29, %s40_s29 }
  0x2b   :  { %p882_p5 = scmp.ne.s32.totalorder %s40_s29, %s881_s19  ;;  %p887_p7 = scmp.lt.s32.totalorder %s881_s19, %s881_s19 }
  0x2d   :  { %p888_p8 = por %p887_p7, %p886_p6 }
  0x2f   :  { %p889_p9 = pnand %p888_p8, %p882_p5 }
  0x31   :  { %892 = shalt.err (!%p889_p9)
}
  0x32   :  { %42 = dma.hbm_to_vmem [thread:$0]  %s1040_s2, 128, %s40_s29, [#allocation6]  }
  0x33   :  { %915 = dma.done.wait [#allocation3], 128  }
  0x34   :  { %916 = vsyncadd [#allocation3], 4294967168 }
  0x35   :  { %917 = dma.done.wait [#allocation6], 8320  }
  0x36   :  { %918 = vsyncadd [#allocation6], 4294958976  ;;  %v926_v0 = vmov 0.0|0.0   ;;  %vm927_vm0 = vmmov 0   ;;  %v928_v1 = vmov 0.0   ;;  %v53_v2 = vld [vmem:[#allocation5] sm:$0xff] }
  0x37   :  { %718 = vmatprep.subr.bf16.mxu0 %v926_v0  ;;  %610 = vmatprep.mubr.msk.f32.mxu0 %vm927_vm0, %v928_v1  ;;  %v54_v3 = vld [vmem:[#allocation5 + $0x8] sm:$0xff]  ;;  %v55_v4 = vld [vmem:[#allocation5 + $0x10] sm:$0xff]  ;;  %v56_v6 = vld [vmem:[#allocation5 + $0x18] sm:$0xff]  ;;  %s929_s2 = smov [#allocation8]  }
  0x38   :  { %742 = vmatprep.subr.bf16.mxu1 %v926_v0  ;;  %645 = vmatprep.mubr.msk.f32.mxu1 %vm927_vm0, %v928_v1  ;;  %v719_v5 = vpack.c.bf16 %v54_v3, %v53_v2  ;;  %v722_v7 = vpack.c.bf16 %v56_v6, %v55_v4  ;;  %v57_v8 = vld [vmem:[#allocation5 + $0x20] sm:$0xff]  ;;  %v58_v9 = vld [vmem:[#allocation5 + $0x28] sm:$0xff]  ;;  %v59_v11 = vld [vmem:[#allocation5 + $0x30] sm:$0xff]  ;;  %s492_s21 = sshll.u32 %s929_s2, 4  ;;  %s493_s21 = int_to_ptr.vmem [resolvable:$true] %s492_s21 }
  0x39   :  { %v725_v10 = vpack.c.bf16 %v58_v9, %v57_v8  ;;  %v60_v12 = vld [vmem:[#allocation5 + $0x38] sm:$0xff]  ;;  %v61_v14 = vld [vmem:[#allocation5 + $0x40] sm:$0xff]  ;;  %v62_v15 = vld [vmem:[#allocation5 + $0x48] sm:$0xff]  ;;  %s893_s22 = scalar_lea.vmem %s493_s21, 128  ;;  %p898_p11 = scmp.lt.s32.totalorder %s493_s21, %s493_s21 }
  0x3a   :  { %720 = vmatpush3.bf16.msra.mxu0 %v719_v5  ;;  %v728_v13 = vpack.c.bf16 %v60_v12, %v59_v11  ;;  %v731_v16 = vpack.c.bf16 %v62_v15, %v61_v14  ;;  %v63_v17 = vld [vmem:[#allocation5 + $0x50] sm:$0xff]  ;;  %v64_v18 = vld [vmem:[#allocation5 + $0x58] sm:$0xff]  ;;  %v65_v20 = vld [vmem:[#allocation5 + $0x60] sm:$0xff]  ;;  %p894_p10 = scmp.ne.s32.totalorder %s493_s21, %s893_s22  ;;  %p899_p12 = scmp.lt.s32.totalorder %s893_s22, %s893_s22 }
  0x3b   :  { %721 = vmatprep.subr.bf16.mxu0 %v926_v0  ;;  %v734_v19 = vpack.c.bf16 %v64_v18, %v63_v17  ;;  %v66_v21 = vld [vmem:[#allocation5 + $0x68] sm:$0xff]  ;;  %v67_v23 = vld [vmem:[#allocation5 + $0x70] sm:$0xff]  ;;  %v68_v24 = vld [vmem:[#allocation5 + $0x78] sm:$0xff] }
  0x3c   :  { %v737_v22 = vpack.c.bf16 %v66_v21, %v65_v20  ;;  %v740_v25 = vpack.c.bf16 %v68_v24, %v67_v23  ;;  %v52_v26 = vld [vmem:[#allocation2] sm:$0xff]  ;;  %v177_v27 = vld [vmem:[#allocation5 + $0x80] sm:$0xff]  ;;  %v178_v28 = vld [vmem:[#allocation5 + $0x88] sm:$0xff]  ;;  %p900_p13 = por %p899_p12, %p898_p11 }
  0x3d   :  { %v743_v29 = vpack.c.bf16 %v178_v28, %v177_v27  ;;  %v179_v30 = vld [vmem:[#allocation5 + $0x90] sm:$0xff]  ;;  %v180_v31 = vld [vmem:[#allocation5 + $0x98] sm:$0xff]  ;;  %v181_v33 = vld [vmem:[#allocation5 + $0xa0] sm:$0xff] }
  0x3e   :  { %723 = vmatpush3.bf16.msra.mxu0 %v722_v7  ;;  %v746_v32 = vpack.c.bf16 %v180_v31, %v179_v30  ;;  %v182_v34 = vld [vmem:[#allocation5 + $0xa8] sm:$0xff]  ;;  %v183_v36 = vld [vmem:[#allocation5 + $0xb0] sm:$0xff]  ;;  %v184_v37 = vld [vmem:[#allocation5 + $0xb8] sm:$0xff]  ;;  %p901_p0 = pnand %p900_p13, %p894_p10 }
  0x3f   :  { %724 = vmatprep.subr.bf16.mxu0 %v926_v0  ;;  %744 = vmatpush3.bf16.msra.mxu1 %v743_v29  ;;  %v749_v35 = vpack.c.bf16 %v182_v34, %v181_v33  ;;  %v752_v38 = vpack.c.bf16 %v184_v37, %v183_v36  ;;  %v185_v39 = vld [vmem:[#allocation5 + $0xc0] sm:$0xff]  ;;  %v186_v40 = vld [vmem:[#allocation5 + $0xc8] sm:$0xff]  ;;  %v187_v42 = vld [vmem:[#allocation5 + $0xd0] sm:$0xff] }
  0x40   :  { %745 = vmatprep.subr.bf16.mxu1 %v926_v0  ;;  %v755_v41 = vpack.c.bf16 %v186_v40, %v185_v39  ;;  %v188_v43 = vld [vmem:[#allocation5 + $0xd8] sm:$0xff]  ;;  %v189_v45 = vld [vmem:[#allocation5 + $0xe0] sm:$0xff]  ;;  %v190_v46 = vld [vmem:[#allocation5 + $0xe8] sm:$0xff] }
  0x41   :  { %v758_v44 = vpack.c.bf16 %v188_v43, %v187_v42  ;;  %v761_v47 = vpack.c.bf16 %v190_v46, %v189_v45  ;;  %v191_v48 = vld [vmem:[#allocation5 + $0xf0] sm:$0xff]  ;;  %v192_v49 = vld [vmem:[#allocation5 + $0xf8] sm:$0xff]  ;;  %v502_v51 = vld [vmem:[#allocation7] ss:$0 sm:$0xff] }
  0x42   :  { %726 = vmatpush3.bf16.msra.mxu0 %v725_v10  ;;  %v764_v50 = vpack.c.bf16 %v192_v49, %v191_v48  ;;  %v503_v12 = vld [vmem:[#allocation7 + $0x1] ss:$0 sm:$0xff]  ;;  %v504_v14 = vld [vmem:[#allocation7 + $0x2] ss:$0 sm:$0xff]  ;;  %v302_v18 = vld [vmem:[#allocation5 + $0x108] sm:$0xff] }
  0x43   :  { %727 = vmatprep.subr.bf16.mxu0 %v926_v0  ;;  %747 = vmatpush3.bf16.msra.mxu1 %v746_v32  ;;  %v301_v17 = vld [vmem:[#allocation5 + $0x100] sm:$0xff]  ;;  %v303_v20 = vld [vmem:[#allocation5 + $0x110] sm:$0xff]  ;;  %v304_v21 = vld [vmem:[#allocation5 + $0x118] sm:$0xff] }
  0x44   :  { %748 = vmatprep.subr.bf16.mxu1 %v926_v0  ;;  %v305_v23 = vld [vmem:[#allocation5 + $0x120] sm:$0xff]  ;;  %v306_v24 = vld [vmem:[#allocation5 + $0x128] sm:$0xff]  ;;  %v311_v31 = vld [vmem:[#allocation5 + $0x150] sm:$0xff] }
  0x45   :  { %v309_v28 = vld [vmem:[#allocation5 + $0x140] sm:$0xff]  ;;  %v310_v29 = vld [vmem:[#allocation5 + $0x148] sm:$0xff]  ;;  %v312_v32 = vld [vmem:[#allocation5 + $0x158] sm:$0xff] }
  0x46   :  { %729 = vmatpush3.bf16.msra.mxu0 %v728_v13  ;;  %v779_v30 = vpack.c.bf16 %v310_v29, %v309_v28  ;;  %v782_v33 = vpack.c.bf16 %v312_v32, %v311_v31  ;;  %v313_v34 = vld [vmem:[#allocation5 + $0x160] sm:$0xff]  ;;  %v315_v37 = vld [vmem:[#allocation5 + $0x170] sm:$0xff] }
  0x47   :  { %730 = vmatprep.subr.bf16.mxu0 %v926_v0  ;;  %750 = vmatpush3.bf16.msra.mxu1 %v749_v35  ;;  %v314_v35 = vld [vmem:[#allocation5 + $0x168] sm:$0xff]  ;;  %v394_v40 = vld [vmem:[#allocation5 + $0x180] sm:$0xff]  ;;  %v396_v42 = vld [vmem:[#allocation5 + $0x190] sm:$0xff] }
  0x48   :  { %751 = vmatprep.subr.bf16.mxu1 %v926_v0  ;;  %v785_v36 = vpack.c.bf16 %v314_v35, %v313_v34  ;;  %v398_v46 = vld [vmem:[#allocation5 + $0x1a0] sm:$0xff]  ;;  %v400_v49 = vld [vmem:[#allocation5 + $0x1b0] sm:$0xff] }
  0x49   :  { %v508_v28 = vld [vmem:[#allocation7 + $0x6] ss:$0 sm:$0xff] }
  0x4a   :  { %732 = vmatpush3.bf16.msra.mxu0 %v731_v16 }
  0x4b   :  { %733 = vmatprep.subr.bf16.mxu0 %v926_v0  ;;  %753 = vmatpush3.bf16.msra.mxu1 %v752_v38  ;;  %v316_v38 = vld [vmem:[#allocation5 + $0x178] sm:$0xff] }
  0x4c   :  { %754 = vmatprep.subr.bf16.mxu1 %v926_v0  ;;  %v788_v39 = vpack.c.bf16 %v316_v38, %v315_v37 }
  0x4e   :  { %735 = vmatpush3.bf16.msra.mxu0 %v734_v19  ;;  %v767_v19 = vpack.c.bf16 %v302_v18, %v301_v17 }
  0x4f   :  { %736 = vmatprep.subr.bf16.mxu0 %v926_v0  ;;  %756 = vmatpush3.bf16.msra.mxu1 %v755_v41  ;;  %v395_v41 = vld [vmem:[#allocation5 + $0x188] sm:$0xff] }
  0x50   :  { %757 = vmatprep.subr.bf16.mxu1 %v926_v0  ;;  %v791_v43 = vpack.c.bf16 %v395_v41, %v394_v40 }
  0x52   :  { %738 = vmatpush3.bf16.msra.mxu0 %v737_v22  ;;  %v770_v22 = vpack.c.bf16 %v304_v21, %v303_v20  ;;  %v506_v21 = vld [vmem:[#allocation7 + $0x4] ss:$0 sm:$0xff] }
  0x53   :  { %739 = vmatprep.subr.bf16.mxu0 %v926_v0  ;;  %759 = vmatpush3.bf16.msra.mxu1 %v758_v44  ;;  %v397_v44 = vld [vmem:[#allocation5 + $0x198] sm:$0xff] }
  0x54   :  { %760 = vmatprep.subr.bf16.mxu1 %v926_v0  ;;  %v794_v45 = vpack.c.bf16 %v397_v44, %v396_v42 }
  0x56   :  { %741 = vmatpush3.bf16.msra.mxu0 %v740_v25  ;;  %v773_v25 = vpack.c.bf16 %v306_v24, %v305_v23  ;;  %v507_v23 = vld [vmem:[#allocation7 + $0x5] ss:$0 sm:$0xff] }
  0x57   :  { %766 = vmatprep.subr.bf16.mxu0 %v926_v0  ;;  %762 = vmatpush3.bf16.msra.mxu1 %v761_v47  ;;  %v399_v47 = vld [vmem:[#allocation5 + $0x1a8] sm:$0xff] }
  0x58   :  { %763 = vmatprep.subr.bf16.mxu1 %v926_v0  ;;  %v797_v48 = vpack.c.bf16 %v399_v47, %v398_v46 }
  0x59   :  { %611 = vmatmul.mubr.f32.vlgmr.msra.gmra.mrb[0].mxu0 %v52_v26  ;;  %v307_v26 = vld [vmem:[#allocation5 + $0x130] sm:$0xff] }
  0x5a   :  { %680 = vmatprep.mubr.msk.f32.mxu0 %vm927_vm0, %v928_v1  ;;  %768 = vmatpush3.bf16.msra.mxu0 %v767_v19 }
  0x5b   :  { %765 = vmatpush3.bf16.msra.mxu1 %v764_v50  ;;  %769 = vmatprep.subr.bf16.mxu0 %v926_v0  ;;  %v401_v50 = vld [vmem:[#allocation5 + $0x1b8] sm:$0xff] }
  0x5c   :  { %790 = vmatprep.subr.bf16.mxu1 %v926_v0 }
  0x5e   :  { %771 = vmatpush3.bf16.msra.mxu0 %v770_v22 }
  0x5f   :  { %772 = vmatprep.subr.bf16.mxu0 %v926_v0 }
  0x62   :  { %774 = vmatpush3.bf16.msra.mxu0 %v773_v25 }
  0x63   :  { %775 = vmatprep.subr.bf16.mxu0 %v926_v0 }
 0x12c   :  { %v140_v52 = vpop.f32.mrb[0].mxu0 }
 0x12d   :  { %v141_v53 = vadd.f32 %v502_v51, %v140_v52  ;;  %v612_v54 = vpop.f32.mrb[1].mxu0  ;;  %v800_v51 = vpack.c.bf16 %v401_v50, %v400_v49  ;;  %v402_v52 = vld [vmem:[#allocation5 + $0x1c0] sm:$0xff] }
 0x12f   :  { %v144_v55 = vmax.f32 %v141_v53, 0.0  ;;  %v403_v53 = vld [vmem:[#allocation5 + $0x1c8] sm:$0xff] }
 0x130   :  { %v803_v54 = vpack.c.bf16 %v403_v53, %v402_v52 }
 0x131   :  { %v145_v56 = vrot.slane %v144_v55, 4 }
 0x133   :  { %v146_v57 = vadd.f32 %v145_v56, %v144_v55  ;;  %v405_v56 = vld [vmem:[#allocation5 + $0x1d8] sm:$0xff] }
 0x135   :  { %v147_v58 = vrot.slane %v146_v57, 2 }
 0x137   :  { %v148_v59 = vadd.f32 %v147_v58, %v146_v57  ;;  %v406_v58 = vld [vmem:[#allocation5 + $0x1e0] sm:$0xff] }
 0x139   :  { %v149_v60 = vrot.slane %v148_v59, 1 }
 0x13b   :  { %v150_v61 = vadd.f32 %v149_v60, %v148_v59  ;;  %v407_v59 = vld [vmem:[#allocation5 + $0x1e8] sm:$0xff] }
 0x13c   :  { %v809_v60 = vpack.c.bf16 %v407_v59, %v406_v58 }
 0x13d   :  { %v151_v62 = vmul.f32 0.125, %v150_v61  ;;  %v505_v61 = vld [vmem:[#allocation7 + $0x3] ss:$0 sm:$0xff] }
 0x13f   :  { %v152_v63 = vsub.f32 %v144_v55, %v151_v62  ;;  %v404_v55 = vld [vmem:[#allocation5 + $0x1d0] sm:$0xff] }
 0x140   :  { %v806_v57 = vpack.c.bf16 %v405_v56, %v404_v55 }
 0x141   :  { %v153_v2 = vmul.f32 %v152_v63, %v152_v63 }
 0x143   :  { %v154_v3 = vrot.slane %v153_v2, 4 }
 0x145   :  { %v155_v4 = vadd.f32 %v154_v3, %v153_v2 }
 0x147   :  { %v156_v5 = vrot.slane %v155_v4, 2 }
 0x149   :  { %v157_v6 = vadd.f32 %v156_v5, %v155_v4 }
 0x14b   :  { %v158_v7 = vrot.slane %v157_v6, 1 }
 0x14d   :  { %v159_v8 = vadd.f32 %v158_v7, %v157_v6 }
 0x14f   :  { %v160_v9 = vmul.f32 0.125, %v159_v8 }
 0x151   :  { %v161_v10 = vadd.f32 1e-05, %v160_v9 }
 0x153   :  { %823 = vrsqrt.f32 %v161_v10 }
 0x15d   :  { %v824_v11 = vpop.eup %823 }
 0x15e   :  { %v163_v13 = vmul.f32 %v824_v11, %v152_v63 }
 0x160   :  { %v169_v15 = vmul.f32 %v503_v12, %v163_v13 }
 0x162   :  { %v175_v16 = vadd.f32 %v504_v14, %v169_v15 }
 0x164   :  { %646 = vmatmul.mubr.f32.vlgmr.msra.gmra.mrb[0].mxu1 %v175_v16 }
 0x165   :  { %715 = vmatprep.mubr.msk.f32.mxu1 %vm927_vm0, %v928_v1  ;;  %v308_v1 = vld [vmem:[#allocation5 + $0x138] sm:$0xff]  ;;  %792 = vmatpush3.bf16.msra.mxu1 %v791_v43 }
 0x166   :  { %v776_v27 = vpack.c.bf16 %v308_v1, %v307_v26  ;;  %793 = vmatprep.subr.bf16.mxu1 %v926_v0  ;;  %v408_v26 = vld [vmem:[#allocation5 + $0x1f0] sm:$0xff]  ;;  %v409_v1 = vld [vmem:[#allocation5 + $0x1f8] sm:$0xff] }
 0x168   :  { %777 = vmatpush3.bf16.msra.mxu0 %v776_v27  ;;  %v812_v27 = vpack.c.bf16 %v409_v1, %v408_v26 }
 0x169   :  { %778 = vmatprep.subr.bf16.mxu0 %v926_v0  ;;  %795 = vmatpush3.bf16.msra.mxu1 %v794_v45 }
 0x16a   :  { %796 = vmatprep.subr.bf16.mxu1 %v926_v0 }
 0x16c   :  { %780 = vmatpush3.bf16.msra.mxu0 %v779_v30 }
 0x16d   :  { %781 = vmatprep.subr.bf16.mxu0 %v926_v0  ;;  %798 = vmatpush3.bf16.msra.mxu1 %v797_v48 }
 0x16e   :  { %799 = vmatprep.subr.bf16.mxu1 %v926_v0 }
 0x170   :  { %783 = vmatpush3.bf16.msra.mxu0 %v782_v33  ;;  %v509_v33 = vld [vmem:[#allocation7 + $0x7] ss:$0 sm:$0xff] }
 0x171   :  { %784 = vmatprep.subr.bf16.mxu0 %v926_v0  ;;  %801 = vmatpush3.bf16.msra.mxu1 %v800_v51 }
 0x172   :  { %802 = vmatprep.subr.bf16.mxu1 %v926_v0 }
 0x174   :  { %786 = vmatpush3.bf16.msra.mxu0 %v785_v36 }
 0x175   :  { %787 = vmatprep.subr.bf16.mxu0 %v926_v0  ;;  %804 = vmatpush3.bf16.msra.mxu1 %v803_v54 }
 0x176   :  { %805 = vmatprep.subr.bf16.mxu1 %v926_v0 }
 0x178   :  { %789 = vmatpush3.bf16.msra.mxu0 %v788_v39 }
 0x179   :  { %807 = vmatpush3.bf16.msra.mxu1 %v806_v57 }
 0x17a   :  { %808 = vmatprep.subr.bf16.mxu1 %v926_v0 }
 0x17d   :  { %810 = vmatpush3.bf16.msra.mxu1 %v809_v60 }
 0x17e   :  { %811 = vmatprep.subr.bf16.mxu1 %v926_v0 }
 0x181   :  { %813 = vmatpush3.bf16.msra.mxu1 %v812_v27 }
 0x237   :  { %v264_v62 = vpop.f32.mrb[0].mxu1 }
 0x238   :  { %v265_v63 = vadd.f32 %v505_v61, %v264_v62  ;;  %v647_v2 = vpop.f32.mrb[1].mxu1 }
 0x23a   :  { %v268_v3 = vmax.f32 %v265_v63, 0.0 }
 0x23c   :  { %v269_v4 = vrot.slane %v268_v3, 4 }
 0x23e   :  { %v270_v5 = vadd.f32 %v269_v4, %v268_v3 }
 0x240   :  { %v271_v6 = vrot.slane %v270_v5, 2 }
 0x242   :  { %v272_v7 = vadd.f32 %v271_v6, %v270_v5 }
 0x244   :  { %v273_v8 = vrot.slane %v272_v7, 1 }
 0x246   :  { %v274_v9 = vadd.f32 %v273_v8, %v272_v7 }
 0x248   :  { %v275_v10 = vmul.f32 0.125, %v274_v9 }
 0x24a   :  { %v276_v11 = vsub.f32 %v268_v3, %v275_v10 }
 0x24c   :  { %v277_v12 = vmul.f32 %v276_v11, %v276_v11 }
 0x24e   :  { %v278_v13 = vrot.slane %v277_v12, 4 }
 0x250   :  { %v279_v14 = vadd.f32 %v278_v13, %v277_v12 }
 0x252   :  { %v280_v15 = vrot.slane %v279_v14, 2 }
 0x254   :  { %v281_v16 = vadd.f32 %v280_v15, %v279_v14 }
 0x256   :  { %v282_v17 = vrot.slane %v281_v16, 1 }
 0x258   :  { %v283_v0 = vadd.f32 %v282_v17, %v281_v16 }
 0x25a   :  { %v284_v18 = vmul.f32 0.125, %v283_v0 }
 0x25c   :  { %v285_v19 = vadd.f32 1e-05, %v284_v18 }
 0x25e   :  { %825 = vrsqrt.f32 %v285_v19 }
 0x268   :  { %v826_v20 = vpop.eup %825 }
 0x269   :  { %v287_v22 = vmul.f32 %v826_v20, %v276_v11 }
 0x26b   :  { %v293_v24 = vmul.f32 %v506_v21, %v287_v22 }
 0x26d   :  { %v299_v25 = vadd.f32 %v507_v23, %v293_v24 }
 0x26f   :  { %681 = vmatmul.mubr.f32.vlgmr.msra.gmra.mrb[2].mxu0 %v299_v25 }
 0x342   :  { %v388_v29 = vpop.f32.mrb[2].mxu0 }
 0x343   :  { %v389_v30 = vadd.f32 %v508_v28, %v388_v29  ;;  %v682_v31 = vpop.f32.mrb[3].mxu0 }
 0x345   :  { %v392_v32 = vmax.f32 %v389_v30, 0.0 }
 0x347   :  { %716 = vmatmul.mubr.f32.vlgmr.msra.gmra.mrb[2].mxu1 %v392_v32 }
 0x41a   :  { %v481_v34 = vpop.f32.mrb[2].mxu1 }
 0x41b   :  { %v482_v35 = vadd.f32 %v509_v33, %v481_v34  ;;  %v717_v36 = vpop.f32.mrb[3].mxu1 }
 0x41d   :  { %485 = vst [vmem:[#allocation8] sm:$0xff] %v482_v35 }
 0x41e   :  { %904 = shalt.err (!%p901_p0)
}
 0x41f   :  { %s905_s25 = scalar_lea.hbm %s1041_s3, 128 }
 0x420   :  { %p906_p1 = scmp.ne.s32.totalorder %s1041_s3, %s905_s25  ;;  %p909_p2 = scmp.lt.u32.totalorder %s905_s25, %s1041_s3 }
 0x422   :  { %p911_p3 = pnand %p909_p2, %p906_p1 }
 0x424   :  { %914 = shalt.err (!%p911_p3)
}
 0x425   :  { %495 = dma.vmem_to_hbm [thread:$0]  %s493_s21, 128, %s1041_s3, [#allocation4]  }
 0x426   :  { %919 = dma.done.wait [#allocation4], 128  }
 0x427   :  { %920 = vsyncadd [#allocation4], 4294967168 }
 0x428   :  { %499 = vsyncpa [#allocation3], 1 }
 0x429   :  { %500 = vsyncpa [#allocation6], 1 }
 0x42a   :  { %501 = vsyncpa [#allocation4], 1 }

</bundles_post_ra>
